<compile_context>
chip_gen: v5e
topology: v5e:2x2
jax: 0.10.0
libtpu: 0.0.40
codegen_flags: <defaults>
</compile_context>

<pallas_src>
import functools

import jax
import jax.numpy as jnp
from jax import lax
from jax.experimental import pallas as pl
from jax.experimental.pallas import tpu as pltpu

EPS = 1e-5  # PyTorch BatchNorm2d default


def _round_up(x, m):
    return (x + m - 1) // m * m


def conv_stats_kernel(patch_ref, w_ref, b_ref, conv_ref, sum_ref, ssq_ref,
                      *, tm, m_total):
    """One M-tile of the im2col GEMM + per-channel sum / sumsq accumulation."""
    pid = pl.program_id(0)

    @pl.when(pid == 0)
    def _():
        sum_ref[...] = jnp.zeros_like(sum_ref)
        ssq_ref[...] = jnp.zeros_like(ssq_ref)

    acc = jnp.dot(patch_ref[...], w_ref[...],
                  preferred_element_type=jnp.float32)
    acc = acc + b_ref[...]
    conv_ref[...] = acc

    if m_total % tm == 0:
        # every tile is full: no row masking needed
        sum_ref[...] += jnp.sum(acc, axis=0, keepdims=True)
        ssq_ref[...] += jnp.sum(acc * acc, axis=0, keepdims=True)
    else:
        # mask padded rows so the global BN stats stay exact
        rows = pid * tm + lax.broadcasted_iota(jnp.int32, (tm, 1), 0)
        valid = (rows < m_total).astype(jnp.float32)
        masked = acc * valid
        sum_ref[...] += jnp.sum(masked, axis=0, keepdims=True)
        ssq_ref[...] += jnp.sum(masked * acc, axis=0, keepdims=True)


def bn_relu_kernel(conv_ref, scale_ref, shift_ref, out_ref):
    out_ref[...] = jnp.maximum(
        conv_ref[...] * scale_ref[...] + shift_ref[...], 0.0)


def conv_block_forward(x_nchw, conv_w, conv_b, bn_gamma, bn_beta, *,
                       tm=512, mxu_dtype=jnp.bfloat16, eps=EPS):
    """x_nchw: (B, Cin, H, W) f32. conv_w: (Cout, Cin, 3, 3). Returns NCHW f32."""
    B, Cin, H, W = x_nchw.shape
    Cout = conv_w.shape[0]
    M = B * H * W
    K = 9 * Cin

    # lane / sublane friendly padded sizes
    Kp = _round_up(K, 128)            # contraction depth -> full vreg lanes
    Cp = _round_up(Cout, 128)         # lane-dense output (unmasked vst)
    tm_eff = _round_up(min(tm, _round_up(M, 8)), 8)
    Mp = _round_up(M, tm_eff)
    n_tiles = Mp // tm_eff

    # ---- glue: NCHW -> NHWC, spatial pad, im2col ----
    # TODO(synk): build the 9*Cin patch slab per M-tile inside the kernel
    # (halo BlockSpec on the padded NHWC input) to avoid the 9x im2col HBM
    # inflation; kept in the wrapper at these small shapes.
    x_nhwc = jnp.transpose(x_nchw, (0, 2, 3, 1))
    xp = jnp.pad(x_nhwc, ((0, 0), (1, 1), (1, 1), (0, 0)))
    patches = jnp.concatenate(
        [xp[:, dy:dy + H, dx:dx + W, :] for dy in range(3) for dx in range(3)],
        axis=-1).reshape(M, K)
    patches = jnp.pad(patches, ((0, Mp - M), (0, Kp - K))).astype(mxu_dtype)

    # weight matrix matching the (dy, dx, ci) patch feature order
    w_mat = jnp.transpose(conv_w, (2, 3, 1, 0)).reshape(K, Cout)
    w_mat = jnp.pad(w_mat, ((0, Kp - K), (0, Cp - Cout))).astype(mxu_dtype)
    b_row = jnp.pad(conv_b.reshape(1, Cout).astype(jnp.float32),
                    ((0, 0), (0, Cp - Cout)))
    g_row = jnp.pad(bn_gamma.reshape(1, Cout).astype(jnp.float32),
                    ((0, 0), (0, Cp - Cout)))
    be_row = jnp.pad(bn_beta.reshape(1, Cout).astype(jnp.float32),
                     ((0, 0), (0, Cp - Cout)))

    isz = jnp.dtype(mxu_dtype).itemsize
    cost1 = pl.CostEstimate(
        flops=2 * Mp * Kp * Cp,
        transcendentals=0,
        bytes_accessed=Mp * Kp * isz + Kp * Cp * isz + Mp * Cp * 4 + 3 * Cp * 4)

    # ---- pass 1: GEMM + bias + global per-channel sum / sumsq ----
    conv_flat, s, ss = pl.pallas_call(
        functools.partial(conv_stats_kernel, tm=tm_eff, m_total=M),
        out_shape=(
            jax.ShapeDtypeStruct((Mp, Cp), jnp.float32),
            jax.ShapeDtypeStruct((1, Cp), jnp.float32),
            jax.ShapeDtypeStruct((1, Cp), jnp.float32),
        ),
        grid=(n_tiles,),
        in_specs=[
            pl.BlockSpec((tm_eff, Kp), lambda i: (i, 0)),
            pl.BlockSpec((Kp, Cp), lambda i: (0, 0)),    # resident across M
            pl.BlockSpec((1, Cp), lambda i: (0, 0)),     # resident across M
        ],
        out_specs=(
            pl.BlockSpec((tm_eff, Cp), lambda i: (i, 0)),
            pl.BlockSpec((1, Cp), lambda i: (0, 0)),     # stats accumulator
            pl.BlockSpec((1, Cp), lambda i: (0, 0)),     # stats accumulator
        ),
        compiler_params=pltpu.CompilerParams(
            dimension_semantics=("arbitrary",),          # carries BN stats
            vmem_limit_bytes=32 * 1024 * 1024),
        cost_estimate=cost1,
    )(patches, w_mat, b_row)

    # fold BN into one per-channel scale/shift (tiny O(Cout) work, f32)
    mean = s / float(M)
    var = jnp.maximum(ss / float(M) - mean * mean, 0.0)   # biased, like PyTorch
    inv_std = lax.rsqrt(var + eps)
    scale = g_row * inv_std
    shift = be_row - mean * scale

    cost2 = pl.CostEstimate(
        flops=3 * Mp * Cp, transcendentals=0,
        bytes_accessed=2 * Mp * Cp * 4 + 2 * Cp * 4)

    # ---- pass 2: normalize + ReLU (independent tiles -> "parallel") ----
    out_flat = pl.pallas_call(
        bn_relu_kernel,
        out_shape=jax.ShapeDtypeStruct((Mp, Cp), jnp.float32),
        grid=(n_tiles,),
        in_specs=[
            pl.BlockSpec((tm_eff, Cp), lambda i: (i, 0)),
            pl.BlockSpec((1, Cp), lambda i: (0, 0)),
            pl.BlockSpec((1, Cp), lambda i: (0, 0)),
        ],
        out_specs=pl.BlockSpec((tm_eff, Cp), lambda i: (i, 0)),
        compiler_params=pltpu.CompilerParams(
            dimension_semantics=("parallel",),           # megacore on v7x
            vmem_limit_bytes=32 * 1024 * 1024),
        cost_estimate=cost2,
    )(conv_flat, scale, shift)

    out = out_flat[:M, :Cout].reshape(B, H, W, Cout)
    # TODO(synk): keep activations NHWC end-to-end in a full network to drop
    # this transpose (extra HBM pass); kept to match the NCHW module output.
    return jnp.transpose(out, (0, 3, 1, 2))


def reference_forward(x_nchw, conv_w, conv_b, bn_gamma, bn_beta):
    """Pure-JAX f32 reference (NCHW conv + training-mode BN + ReLU)."""
    y = lax.conv_general_dilated(
        x_nchw, conv_w, window_strides=(1, 1), padding=((1, 1), (1, 1)),
        dimension_numbers=("NCHW", "OIHW", "NCHW"))
    y = y + conv_b.reshape(1, -1, 1, 1)
    mean = jnp.mean(y, axis=(0, 2, 3), keepdims=True)
    var = jnp.mean((y - mean) ** 2, axis=(0, 2, 3), keepdims=True)
    y = (y - mean) * lax.rsqrt(var + EPS)
    y = y * bn_gamma.reshape(1, -1, 1, 1) + bn_beta.reshape(1, -1, 1, 1)
    return jnp.maximum(y, 0.0)


if __name__ == "__main__":
    B, Cin, H, W = 2, 4, 16, 16
    Cout = 64  # h_dim default in the PyTorch module

    key = jax.random.PRNGKey(0)
    kx, kw, kb = jax.random.split(key, 3)

    x = jax.random.normal(kx, (B, Cin, H, W), dtype=jnp.float32)

    # Deterministic PyTorch-style uniform fan-in init.
    fan_in = Cin * 3 * 3
    bound = 1.0 / (fan_in ** 0.5)
    conv_w = jax.random.uniform(kw, (Cout, Cin, 3, 3), jnp.float32, -bound, bound)
    conv_b = jax.random.uniform(kb, (Cout,), jnp.float32, -bound, bound)
    bn_gamma = jnp.ones((Cout,), jnp.float32)
    bn_beta = jnp.zeros((Cout,), jnp.float32)

    ref = reference_forward(x, conv_w, conv_b, bn_gamma, bn_beta)

    # f32 MXU path: tight tolerance (exact semantics of the PyTorch module).
    out_f32 = jax.block_until_ready(
        conv_block_forward(x, conv_w, conv_b, bn_gamma, bn_beta,
                           tm=128, mxu_dtype=jnp.float32))
    assert out_f32.shape == (B, Cout, H, W)
    assert jnp.allclose(out_f32, ref, atol=2e-3, rtol=2e-3)

    # bf16 MXU-input path (default; preferred on v6e/v7x, f32 accumulate &
    # f32 BN math): looser tolerance appropriate for bf16 operands.
    out_bf16 = jax.block_until_ready(
        conv_block_forward(x, conv_w, conv_b, bn_gamma, bn_beta, tm=128))
    assert out_bf16.shape == (B, Cout, H, W)
    assert jnp.allclose(out_bf16, ref, atol=2e-2, rtol=2e-2)

    print("KERNEL_OK")
</pallas_src>

<mosaic_0001>
module attributes {stable_mosaic.version = 11 : i64} {
  func.func @conv_stats_kernel(%arg0: i32, %arg1: memref<128x128xf32, #tpu.memory_space<vmem>>, %arg2: memref<128x128xf32, #tpu.memory_space<vmem>>, %arg3: memref<1x128xf32, #tpu.memory_space<vmem>>, %arg4: memref<128x128xf32, #tpu.memory_space<vmem>>, %arg5: memref<1x128xf32, #tpu.memory_space<vmem>>, %arg6: memref<1x128xf32, #tpu.memory_space<vmem>>) attributes {dimension_semantics = [#tpu.dimension_semantics<arbitrary>], iteration_bounds = array<i64: 4>, scalar_prefetch = 0 : i64, scratch_operands = 0 : i64, tpu.core_type = #tpu.core_type<tc>, window_params = [{transform_indices = @transform_0, window_bounds = array<i64: 128, 128>}, {pipeline_mode = #tpu.pipeline_mode<synchronous>, transform_indices = @transform_1, window_bounds = array<i64: 128, 128>}, {pipeline_mode = #tpu.pipeline_mode<synchronous>, transform_indices = @transform_2, window_bounds = array<i64: 1, 128>}, {transform_indices = @transform_3, window_bounds = array<i64: 128, 128>}, {pipeline_mode = #tpu.pipeline_mode<synchronous>, transform_indices = @transform_4, window_bounds = array<i64: 1, 128>}, {pipeline_mode = #tpu.pipeline_mode<synchronous>, transform_indices = @transform_5, window_bounds = array<i64: 1, 128>}]} {
    %c0_i32 = arith.constant 0 : i32
    %0 = arith.cmpi eq, %arg0, %c0_i32 : i32
    %1 = arith.extui %0 : i1 to i32
    %c0_i32_0 = arith.constant 0 : i32
    %2 = arith.cmpi ne, %1, %c0_i32_0 : i32
    scf.if %2 {
      %cst_18 = arith.constant 0.000000e+00 : f32
      %21 = vector.broadcast %cst_18 : f32 to vector<1x128xf32>
      %c0_19 = arith.constant 0 : index
      %c0_20 = arith.constant 0 : index
      %22 = vector.load %arg5[%c0_19, %c0_20] : memref<1x128xf32, #tpu.memory_space<vmem>>, vector<1x128xf32>
      tpu.vector_store %arg5[%c0_19, %c0_20], %21 {strides = array<i32>} : memref<1x128xf32, #tpu.memory_space<vmem>>, vector<1x128xf32>,
      %cst_21 = arith.constant 0.000000e+00 : f32
      %23 = vector.broadcast %cst_21 : f32 to vector<1x128xf32>
      %c0_22 = arith.constant 0 : index
      %c0_23 = arith.constant 0 : index
      %24 = vector.load %arg6[%c0_22, %c0_23] : memref<1x128xf32, #tpu.memory_space<vmem>>, vector<1x128xf32>
      tpu.vector_store %arg6[%c0_22, %c0_23], %23 {strides = array<i32>} : memref<1x128xf32, #tpu.memory_space<vmem>>, vector<1x128xf32>,
    } else {
    }
    %c0 = arith.constant 0 : index
    %c0_1 = arith.constant 0 : index
    %3 = vector.load %arg1[%c0, %c0_1] : memref<128x128xf32, #tpu.memory_space<vmem>>, vector<128x128xf32>
    %c0_2 = arith.constant 0 : index
    %c0_3 = arith.constant 0 : index
    %4 = vector.load %arg2[%c0_2, %c0_3] : memref<128x128xf32, #tpu.memory_space<vmem>>, vector<128x128xf32>
    %cst = arith.constant dense<0.000000e+00> : vector<128x128xf32>
    %5 = tpu.matmul %3, %4, %cst {dimension_numbers = #tpu.dot_dimension_numbers<[1], [0], [0], [1], [0, 0, 1, 1], [], []>} : vector<128x128xf32>, vector<128x128xf32>, vector<128x128xf32> -> vector<128x128xf32>
    %c0_4 = arith.constant 0 : index
    %c0_5 = arith.constant 0 : index
    %6 = vector.load %arg3[%c0_4, %c0_5] : memref<1x128xf32, #tpu.memory_space<vmem>>, vector<1x128xf32>
    %7 = vector.broadcast %6 : vector<1x128xf32> to vector<128x128xf32>
    %8 = arith.addf %5, %7 : vector<128x128xf32>
    %c0_6 = arith.constant 0 : index
    %c0_7 = arith.constant 0 : index
    %9 = vector.load %arg4[%c0_6, %c0_7] : memref<128x128xf32, #tpu.memory_space<vmem>>, vector<128x128xf32>
    tpu.vector_store %arg4[%c0_6, %c0_7], %8 {strides = array<i32>} : memref<128x128xf32, #tpu.memory_space<vmem>>, vector<128x128xf32>,
    %c0_8 = arith.constant 0 : index
    %c0_9 = arith.constant 0 : index
    %10 = vector.load %arg5[%c0_8, %c0_9] : memref<1x128xf32, #tpu.memory_space<vmem>>, vector<1x128xf32>
    %cst_10 = arith.constant dense<0.000000e+00> : vector<128xf32>
    %11 = vector.multi_reduction <add>, %8, %cst_10 [0] : vector<128x128xf32> to vector<128xf32>
    %12 = vector.shape_cast %11 : vector<128xf32> to vector<1x128xf32>
    %13 = arith.addf %10, %12 : vector<1x128xf32>
    %c0_11 = arith.constant 0 : index
    %c0_12 = arith.constant 0 : index
    %14 = vector.load %arg5[%c0_11, %c0_12] : memref<1x128xf32, #tpu.memory_space<vmem>>, vector<1x128xf32>
    tpu.vector_store %arg5[%c0_11, %c0_12], %13 {strides = array<i32>} : memref<1x128xf32, #tpu.memory_space<vmem>>, vector<1x128xf32>,
    %c0_13 = arith.constant 0 : index
    %c0_14 = arith.constant 0 : index
    %15 = vector.load %arg6[%c0_13, %c0_14] : memref<1x128xf32, #tpu.memory_space<vmem>>, vector<1x128xf32>
    %16 = arith.mulf %8, %8 : vector<128x128xf32>
    %cst_15 = arith.constant dense<0.000000e+00> : vector<128xf32>
    %17 = vector.multi_reduction <add>, %16, %cst_15 [0] : vector<128x128xf32> to vector<128xf32>
    %18 = vector.shape_cast %17 : vector<128xf32> to vector<1x128xf32>
    %19 = arith.addf %15, %18 : vector<1x128xf32>
    %c0_16 = arith.constant 0 : index
    %c0_17 = arith.constant 0 : index
    %20 = vector.load %arg6[%c0_16, %c0_17] : memref<1x128xf32, #tpu.memory_space<vmem>>, vector<1x128xf32>
    tpu.vector_store %arg6[%c0_16, %c0_17], %19 {strides = array<i32>} : memref<1x128xf32, #tpu.memory_space<vmem>>, vector<1x128xf32>,
    return
  }
  func.func @transform_0(%arg0: i32) -> (i32, i32) {
    %c0_i32 = arith.constant 0 : i32
    %c0_i32_0 = arith.constant 0 : i32
    return %arg0, %c0_i32 : i32, i32
  }
  func.func @transform_1(%arg0: i32) -> (i32, i32) {
    %c0_i32 = arith.constant 0 : i32
    %c0_i32_0 = arith.constant 0 : i32
    %c0_i32_1 = arith.constant 0 : i32
    return %c0_i32, %c0_i32_0 : i32, i32
  }
  func.func @transform_2(%arg0: i32) -> (i32, i32) {
    %c0_i32 = arith.constant 0 : i32
    %c0_i32_0 = arith.constant 0 : i32
    %c0_i32_1 = arith.constant 0 : i32
    return %c0_i32, %c0_i32_0 : i32, i32
  }
  func.func @transform_3(%arg0: i32) -> (i32, i32) {
    %c0_i32 = arith.constant 0 : i32
    %c0_i32_0 = arith.constant 0 : i32
    return %arg0, %c0_i32 : i32, i32
  }
  func.func @transform_4(%arg0: i32) -> (i32, i32) {
    %c0_i32 = arith.constant 0 : i32
    %c0_i32_0 = arith.constant 0 : i32
    %c0_i32_1 = arith.constant 0 : i32
    return %c0_i32, %c0_i32_0 : i32, i32
  }
  func.func @transform_5(%arg0: i32) -> (i32, i32) {
    %c0_i32 = arith.constant 0 : i32
    %c0_i32_0 = arith.constant 0 : i32
    %c0_i32_1 = arith.constant 0 : i32
    return %c0_i32, %c0_i32_0 : i32, i32
  }
}

</mosaic_0001>

<bundles_post_ra>
// kernel: tpu_custom_call.1
= control target key start
LH: loop header
LB: loop body
LE: loop exit
PB: predicated region body
PF: predicated region fallthrough
CT: control target
= control target key end

     0   :  { %11 = vsyncpa [#allocation3], 0  ;;  %s1218_s0 = inlined_call_operand.hbm [shape: f32[512,128], index: 0, kind: input, shape index: {}]   ;;  %s1219_s1 = inlined_call_operand.hbm [shape: f32[128,128], index: 1, kind: input, shape index: {}]   ;;  %s1220_s2 = inlined_call_operand.vmem [shape: f32[1,128], index: 2, kind: input, shape index: {}]   ;;  %s1221_s3 = inlined_call_operand.hbm [shape: f32[512,128], index: 3, kind: output, shape index: {0}]   ;;  %s1222_s4 = inlined_call_operand.hbm [shape: f32[1,128], index: 4, kind: output, shape index: {1}]   ;;  %s1223_s5 = inlined_call_operand.hbm [shape: f32[1,128], index: 5, kind: output, shape index: {2}]  }
   0x1   :  { %13 = vsyncpa [#allocation3 + $0x1], 0 }
   0x2   :  { %14 = vsyncpa [#allocation6], 0 }
   0x3   :  { %15 = vsyncpa [#allocation4], 0 }
   0x4   :  { %17 = vsyncpa [#allocation4 + $0x1], 0 }
   0x5   :  { %18 = vsyncpa [#allocation9], 0  ;;  %s971_s18 = smov 0   ;;  %s973_s19 = smov 0  }
   0x6   :  { %s975_s20 = smov 0   ;;  %s977_s21 = smov 0  }
   0x7 LB: > { %s992_s22 = sadd.s32 4294967295, %s931_s21   ;;  %s593_s23 = sadd.s32 4294967294, %s931_s21   ;;  %s931_s21 = sphi %s977_s21, %s1240_s21   ;;  %s927_s20 = sphi %s975_s20, %s1239_s20   ;;  %s923_s19 = sphi %s973_s19, %s1238_s19   ;;  %s919_s18 = sphi %s971_s18, %s1237_s18  }
   0x8   : > { %p44_p0 = scmp.ne.s32.totalorder %s923_s19, %s919_s18  ;;  %p45_p1 = scmp.eq.s32.totalorder %s992_s22, 0 }
   0x9   : > { %p1225_p2 = scmp.eq.s32.totalorder %s992_s22, 3  ;;  %p116_p3 = scmp.eq.s32.totalorder %s593_s23, 3 }
   0xa   : > { %p1001_p4 = por %p45_p1, %p44_p0  ;;  %p594_p5 = scmp.ge.s32.totalorder %s931_s21, 1 }
   0xb   : > { %p1006_p6 = por %p116_p3, %p44_p0  ;;  %p165_p7 = scmp.lt.s32.totalorder %s931_s21, 5 }
   0xc   : > { %s176_s28 = sshll.u32 %s1219_s1, 4  ;;  %s933_s30 = smov [#allocation5]   ;;  %s177_s28 = int_to_ptr.hbm [resolvable:$true] %s176_s28 }
   0xd   : > { %p1015_p9 = pnand %p594_p5, %p165_p7  ;;  %s178_s6 = sshll.u32 %s933_s30, 4  ;;  %s179_s6 = int_to_ptr.vmem [resolvable:$true] %s178_s6 }
   0xe   : > { %s1024_s7 = sadd.s32 1, %s931_s21   ;;  %s1224_s8 = smov 128  }
   0xf   : > { %p680_p10 = pneg %p1015_p9  ;;  %s935_s9 = smov 8  }
  0x10   : > { %s28_s10 = ssub.s32 %s931_s21, %s1024_s7  ;;  %s31_s11 = sadd.s32 1, %s927_s20 }
  0x11   : > { %p681_p11 = pnand %p680_p10, %p45_p1  ;;  %p29_p12 = scmp.eq.s32.totalorder %s28_s10, 0 }
  0x12   : > { %p38_p13 = scmp.ne.s32.totalorder %s927_s20, %s923_s19  ;;  %p39_p0 = scmp.eq.s32.totalorder %s931_s21, 0 }
  0x13   : > { %683 = dma.hbm_to_vmem [thread:$0]  (!%p681_p11), %s177_s28, 2048, %s179_s6, [#allocation6], %s1224_s8, %s1224_s8, %s935_s9  }
  0x14   : > { %s1036_s12 = scalar_select %p29_p12, %s927_s20, %s31_s11  }
  0x15   : > { %p1040_p3 = por %p1225_p2, %p38_p13  ;;  %p693_p5 = scmp.lt.s32.totalorder %s931_s21, 4 }
  0x16   : > { %s195_s14 = sand.u32 1, %s927_s20   ;;  %s614_s15 = sshll.u32 %s931_s21, 7 }
  0x17   : > { %p40_p7 = por %p39_p0, %p38_p13  ;;  %s597_s16 = sshll.u32 %s195_s14, 7 }
  0x18   : > { %s204_s26 = scalar_lea.hbm %s1218_s0, %s614_s15  ;;  %s199_s28 = scalar_lea.vmem [#allocation2], %s597_s16 }
  0x19   : > { %s205_s27 = sshll.u32 %s204_s26, 4  ;;  %s207_s30 = sshll.u32 %s199_s28, 4  ;;  %s206_s27 = int_to_ptr.hbm [resolvable:$true] %s205_s27  ;;  %s208_s30 = int_to_ptr.vmem [resolvable:$true] %s207_s30 }
  0x1a   : > { %p1050_p10 = pnand %p693_p5, %p40_p7  ;;  %s196_s10 = scalar_lea.sflag [#allocation3], %s195_s14 }
  0x1b   : > { %s771_s11 = sshra.s32 %s206_s27, 4  ;;  %s778_s16 = scalar_lea.hbm %s1218_s0, 512  ;;  %s772_s11 = int_to_ptr.hbm [resolvable:$true] %s771_s11 }
  0x1c   : > { %s773_s8 = scalar_lea.hbm %s772_s11, 128  ;;  %p775_p12 = pneg %p1050_p10 }
  0x1d   : > { %p774_p11 = scmp.ne.s32.totalorder %s772_s11, %s773_s8  ;;  %p779_p5 = scmp.lt.s32.totalorder %s772_s11, %s1218_s0 }
  0x1e   : > { %p780_p7 = scmp.lt.s32.totalorder %s778_s16, %s773_s8 }
  0x1f   : > { %p776_p13 = pnand %p775_p12, %p774_p11 }
  0x20   : > { %p781_p2 = por %p780_p7, %p779_p5 }
  0x21   : > { %p777_p0 = pneg %p776_p13 }
  0x23   : > { %p782_p8 = pnand %p781_p2, %p777_p0 }
  0x25   : > { %785 = shalt.err (!%p782_p8)
}
  0x26   : > { %s1231_s14 = smov 128   ;;  %219 = sbr.rel (%p1015_p9) target bundleno = 287 (0x11f), region = 32 }
  0x27   : > { %687 = dma.hbm_to_vmem [thread:$0]  (!%p1050_p10), %s206_s27, 2048, %s208_s30, %s196_s10, %s1231_s14, %s1231_s14, %s935_s9  }
  0x28   : > { %s1070_s28 = sand.u32 (!%p1015_p9), 1, %s923_s19  }
  0x29   : > { %s601_s11 = sshll.u32 (!%p1015_p9), %s1070_s28, 7  ;;  %s222_s8 = scalar_lea.sflag (!%p1015_p9), [#allocation3], %s1070_s28 }
  0x2a   : > { %s1074_s15 = scalar_lea.vmem (!%p1015_p9), [#allocation2], %s601_s11 }
  0x2b   : > { %902 = dma.done.wait (%p1001_p4), %s222_s8, 2048  }
  0x2c   : > { %904 = vsyncadd (%p1001_p4), %s222_s8, 4294965248 }
  0x2d   : > { %906 = dma.done.wait (%p45_p1), [#allocation6], 2048  }
  0x2e   : > { %908 = vsyncadd (%p45_p1), [#allocation6], 4294965248  ;;  %s1084_s29 = scalar_lea.vmem [#allocation7], %s601_s11  ;;  %p1232_p2 = scmp.ne.s32.totalorder %s992_s22, 0 }
  0x30   : > { %263 = sbr.rel (%p1232_p2) target bundleno = 56 (0x38), region = 44 }
  0x35   : > { %v936_v0 = vmov 0.0  }
  0x36   : > { %264 = vst [vmem:[#allocation8] sm:$0x1] %v936_v0 }
  0x37   : > { %265 = vst [vmem:[#allocation10] sm:$0x1] %v936_v0 }
  0x38 PF: > { %v297_v1 = vld [vmem:[#allocation5 + $0x78] sm:$0xff]  ;;  %v296_v2 = vld [vmem:[#allocation5 + $0x70] sm:$0xff]  ;;  %v295_v3 = vld [vmem:[#allocation5 + $0x68] sm:$0xff]  ;;  %s615_s27 = sshll.u32 %s992_s22, 7  ;;  %s460_s17 = sshll.u32 %s1084_s29, 4  ;;  %s461_s17 = int_to_ptr.vmem [resolvable:$true] %s460_s17 }
  0x39   : > { %302 = vmatpush.msra.mxu0 %v297_v1  ;;  %616 = vmatpush.msra.mxu1 %v297_v1  ;;  %v294_v4 = vld [vmem:[#allocation5 + $0x60] sm:$0xff]  ;;  %v293_v5 = vld [vmem:[#allocation5 + $0x58] sm:$0xff]  ;;  %v292_v6 = vld [vmem:[#allocation5 + $0x50] sm:$0xff]  ;;  %s459_s10 = scalar_lea.hbm %s1221_s3, %s615_s27  ;;  %s448_s23 = scalar_lea.sflag [#allocation4], %s1070_s28 }
  0x3a   : > { %617 = vmatpush.msra.mxu2 %v297_v1  ;;  %618 = vmatpush.msra.mxu3 %v297_v1  ;;  %v291_v7 = vld [vmem:[#allocation5 + $0x48] sm:$0xff]  ;;  %v290_v8 = vld [vmem:[#allocation5 + $0x40] sm:$0xff]  ;;  %v289_v9 = vld [vmem:[#allocation5 + $0x38] sm:$0xff]  ;;  %s462_s16 = sshll.u32 %s459_s10, 4  ;;  %s463_s16 = int_to_ptr.hbm [resolvable:$true] %s462_s16 }
  0x3b   : > { %303 = vmatpush.msra.mxu0 %v296_v2  ;;  %619 = vmatpush.msra.mxu1 %v296_v2  ;;  %v288_v10 = vld [vmem:[#allocation5 + $0x30] sm:$0xff]  ;;  %v287_v11 = vld [vmem:[#allocation5 + $0x28] sm:$0xff]  ;;  %v286_v12 = vld [vmem:[#allocation5 + $0x20] sm:$0xff]  ;;  %s815_s26 = sshra.s32 %s463_s16, 4  ;;  %s816_s26 = int_to_ptr.hbm [resolvable:$true] %s815_s26 }
  0x3c   : > { %620 = vmatpush.msra.mxu2 %v296_v2  ;;  %621 = vmatpush.msra.mxu3 %v296_v2  ;;  %v285_v13 = vld [vmem:[#allocation5 + $0x18] sm:$0xff]  ;;  %v284_v14 = vld [vmem:[#allocation5 + $0x10] sm:$0xff]  ;;  %v283_v15 = vld [vmem:[#allocation5 + $0x8] sm:$0xff]  ;;  %s817_s14 = scalar_lea.hbm %s816_s26, 128  ;;  %p822_p9 = scmp.lt.s32.totalorder %s816_s26, %s1221_s3 }
  0x3d   : > { %304 = vmatpush.msra.mxu0 %v295_v3  ;;  %622 = vmatpush.msra.mxu1 %v295_v3  ;;  %v282_v16 = vld [vmem:[#allocation5] sm:$0xff]  ;;  %v267_v21 = vld [vmem:[%s1074_s15 + $0x8] sm:$0xff]  ;;  %v268_v25 = vld [vmem:[%s1074_s15 + $0x10] sm:$0xff]  ;;  %p818_p1 = scmp.ne.s32.totalorder %s816_s26, %s817_s14 }
  0x3e   : > { %623 = vmatpush.msra.mxu2 %v295_v3  ;;  %624 = vmatpush.msra.mxu3 %v295_v3  ;;  %v266_v17 = vld [vmem:[%s1074_s15] sm:$0xff]  ;;  %v271_v22 = vld [vmem:[%s1074_s15 + $0x28] sm:$0xff]  ;;  %v272_v26 = vld [vmem:[%s1074_s15 + $0x30] sm:$0xff] }
  0x3f   : > { %305 = vmatpush.msra.mxu0 %v294_v4  ;;  %625 = vmatpush.msra.mxu1 %v294_v4  ;;  %v270_v18 = vld [vmem:[%s1074_s15 + $0x20] sm:$0xff]  ;;  %v275_v23 = vld [vmem:[%s1074_s15 + $0x48] sm:$0xff]  ;;  %v276_v27 = vld [vmem:[%s1074_s15 + $0x50] sm:$0xff]  ;;  %p819_p4 = pnand %p818_p1, %p1040_p3 }
  0x40   : > { %626 = vmatpush.msra.mxu2 %v294_v4  ;;  %627 = vmatpush.msra.mxu3 %v294_v4  ;;  %v274_v19 = vld [vmem:[%s1074_s15 + $0x40] sm:$0xff]  ;;  %v279_v24 = vld [vmem:[%s1074_s15 + $0x68] sm:$0xff]  ;;  %v280_v28 = vld [vmem:[%s1074_s15 + $0x70] sm:$0xff] }
  0x41   : > { %306 = vmatpush.msra.mxu0 %v293_v5  ;;  %628 = vmatpush.msra.mxu1 %v293_v5  ;;  %v278_v20 = vld [vmem:[%s1074_s15 + $0x60] sm:$0xff]  ;;  %v269_v29 = vld [vmem:[%s1074_s15 + $0x18] sm:$0xff]  ;;  %p820_p8 = pneg %p819_p4 }
  0x42   : > { %629 = vmatpush.msra.mxu2 %v293_v5  ;;  %630 = vmatpush.msra.mxu3 %v293_v5  ;;  %v273_v30 = vld [vmem:[%s1074_s15 + $0x38] sm:$0xff]  ;;  %v1107_v33 = vld [vmem:[%s1220_s2] ss:$0 sm:$0xff] }
  0x43   : > { %307 = vmatpush.msra.mxu0 %v292_v6  ;;  %631 = vmatpush.msra.mxu1 %v292_v6  ;;  %v277_v31 = vld [vmem:[%s1074_s15 + $0x58] sm:$0xff] }
  0x44   : > { %632 = vmatpush.msra.mxu2 %v292_v6  ;;  %633 = vmatpush.msra.mxu3 %v292_v6  ;;  %v281_v32 = vld [vmem:[%s1074_s15 + $0x78] sm:$0xff]  ;;  %s821_s15 = scalar_lea.hbm %s1221_s3, 512 }
  0x45   : > { %308 = vmatpush.msra.mxu0 %v291_v7  ;;  %634 = vmatpush.msra.mxu1 %v291_v7  ;;  %p823_p10 = scmp.lt.s32.totalorder %s821_s15, %s817_s14 }
  0x46   : > { %635 = vmatpush.msra.mxu2 %v291_v7  ;;  %636 = vmatpush.msra.mxu3 %v291_v7 }
  0x47   : > { %309 = vmatpush.msra.mxu0 %v290_v8  ;;  %637 = vmatpush.msra.mxu1 %v290_v8  ;;  %p824_p11 = por %p823_p10, %p822_p9 }
  0x48   : > { %638 = vmatpush.msra.mxu2 %v290_v8  ;;  %639 = vmatpush.msra.mxu3 %v290_v8 }
  0x49   : > { %310 = vmatpush.msra.mxu0 %v289_v9  ;;  %640 = vmatpush.msra.mxu1 %v289_v9  ;;  %p825_p12 = pnand %p824_p11, %p820_p8 }
  0x4a   : > { %641 = vmatpush.msra.mxu2 %v289_v9  ;;  %642 = vmatpush.msra.mxu3 %v289_v9 }
  0x4b   : > { %311 = vmatpush.msra.mxu0 %v288_v10  ;;  %643 = vmatpush.msra.mxu1 %v288_v10 }
  0x4c   : > { %644 = vmatpush.msra.mxu2 %v288_v10  ;;  %645 = vmatpush.msra.mxu3 %v288_v10 }
  0x4d   : > { %312 = vmatpush.msra.mxu0 %v287_v11  ;;  %646 = vmatpush.msra.mxu1 %v287_v11 }
  0x4e   : > { %647 = vmatpush.msra.mxu2 %v287_v11  ;;  %648 = vmatpush.msra.mxu3 %v287_v11 }
  0x4f   : > { %313 = vmatpush.msra.mxu0 %v286_v12  ;;  %649 = vmatpush.msra.mxu1 %v286_v12 }
  0x50   : > { %650 = vmatpush.msra.mxu2 %v286_v12  ;;  %651 = vmatpush.msra.mxu3 %v286_v12 }
  0x51   : > { %314 = vmatpush.msra.mxu0 %v285_v13  ;;  %652 = vmatpush.msra.mxu1 %v285_v13 }
  0x52   : > { %653 = vmatpush.msra.mxu2 %v285_v13  ;;  %654 = vmatpush.msra.mxu3 %v285_v13 }
  0x53   : > { %315 = vmatpush.msra.mxu0 %v284_v14  ;;  %655 = vmatpush.msra.mxu1 %v284_v14 }
  0x54   : > { %656 = vmatpush.msra.mxu2 %v284_v14  ;;  %657 = vmatpush.msra.mxu3 %v284_v14 }
  0x55   : > { %316 = vmatpush.msra.mxu0 %v283_v15  ;;  %658 = vmatpush.msra.mxu1 %v283_v15 }
  0x56   : > { %659 = vmatpush.msra.mxu2 %v283_v15  ;;  %660 = vmatpush.msra.mxu3 %v283_v15 }
  0x57   : > { %317 = vmatpush.msra.mxu0 %v282_v16  ;;  %661 = vmatpush.msra.mxu1 %v282_v16 }
  0x58   : > { %318 = vmatmul.f32.vlgmr.msra.gmra.mxu0 %v266_v17  ;;  %330 = vmatmul.f32.vlgmr.msra.gmra.mxu1 %v270_v18 }
  0x59   : > { %662 = vmatpush.msra.mxu2 %v282_v16  ;;  %663 = vmatpush.msra.mxu3 %v282_v16 }
  0x5a   : > { %342 = vmatmul.f32.vlgmr.msra.gmra.mxu2 %v274_v19  ;;  %354 = vmatmul.f32.vlgmr.msra.gmra.mxu3 %v278_v20 }
  0x60   : > { %321 = vmatmul.f32.gmra.mxu0 %v267_v21  ;;  %333 = vmatmul.f32.gmra.mxu1 %v271_v22 }
  0x62   : > { %345 = vmatmul.f32.gmra.mxu2 %v275_v23  ;;  %357 = vmatmul.f32.gmra.mxu3 %v279_v24 }
  0x68   : > { %324 = vmatmul.f32.gmra.mxu0 %v268_v25  ;;  %336 = vmatmul.f32.gmra.mxu1 %v272_v26 }
  0x6a   : > { %348 = vmatmul.f32.gmra.mxu2 %v276_v27  ;;  %360 = vmatmul.f32.gmra.mxu3 %v280_v28 }
  0x70   : > { %327 = vmatmul.f32.gmra.mxu0 %v269_v29  ;;  %339 = vmatmul.f32.gmra.mxu1 %v273_v30 }
  0x72   : > { %351 = vmatmul.f32.gmra.mxu2 %v277_v31  ;;  %363 = vmatmul.f32.gmra.mxu3 %v281_v32 }
  0xd5   : > { %v319_v34 = vpop.f32.mrf.mxu0  ;;  %v331_v35 = vpop.f32.mrf.mxu1 }
  0xd6   : > { %v320_v36 = vadd.f32 %v1107_v33, %v319_v34  ;;  %v332_v37 = vadd.f32 %v1107_v33, %v331_v35 }
  0xd8   : > { %367 = vst [vmem:[%s1084_s29] sm:$0xff] %v320_v36  ;;  %v408_v55 = vmul.f32 %v320_v36, %v320_v36  ;;  %v412_v7 = vmul.f32 %v332_v37, %v332_v37 }
  0xd9   : > { %371 = vst [vmem:[%s1084_s29 + $0x20] sm:$0xff] %v332_v37 }
  0xdd   : > { %v322_v38 = vpop.f32.mrf.mxu0  ;;  %v334_v39 = vpop.f32.mrf.mxu1 }
  0xde   : > { %v323_v40 = vadd.f32 %v1107_v33, %v322_v38  ;;  %v335_v41 = vadd.f32 %v1107_v33, %v334_v39  ;;  %v343_v42 = vpop.f32.mrf.mxu2  ;;  %v355_v43 = vpop.f32.mrf.mxu3 }
  0xdf   : > { %v1116_v44 = vadd.f32 %v1107_v33, %v343_v42  ;;  %v1119_v45 = vadd.f32 %v1107_v33, %v355_v43 }
  0xe0   : > { %368 = vst [vmem:[%s1084_s29 + $0x8] sm:$0xff] %v323_v40  ;;  %v409_v54 = vmul.f32 %v323_v40, %v323_v40  ;;  %v384_v56 = vadd.f32 %v323_v40, %v320_v36  ;;  %v413_v10 = vmul.f32 %v335_v41, %v335_v41 }
  0xe1   : > { %372 = vst [vmem:[%s1084_s29 + $0x28] sm:$0xff] %v335_v41  ;;  %v416_v23 = vmul.f32 %v1116_v44, %v1116_v44 }
  0xe2   : > { %375 = vst [vmem:[%s1084_s29 + $0x40] sm:$0xff] %v1116_v44  ;;  %v424_v60 = vadd.f32 %v409_v54, %v408_v55 }
  0xe3   : > { %379 = vst [vmem:[%s1084_s29 + $0x60] sm:$0xff] %v1119_v45 }
  0xe5   : > { %v325_v46 = vpop.f32.mrf.mxu0  ;;  %v337_v47 = vpop.f32.mrf.mxu1 }
  0xe6   : > { %v326_v48 = vadd.f32 %v1107_v33, %v325_v46  ;;  %v338_v49 = vadd.f32 %v1107_v33, %v337_v47  ;;  %v346_v50 = vpop.f32.mrf.mxu2  ;;  %v358_v51 = vpop.f32.mrf.mxu3 }
  0xe7   : > { %v1130_v52 = vadd.f32 %v1107_v33, %v346_v50  ;;  %v1133_v53 = vadd.f32 %v1107_v33, %v358_v51 }
  0xe8   : > { %369 = vst [vmem:[%s1084_s29 + $0x10] sm:$0xff] %v326_v48  ;;  %v410_v57 = vmul.f32 %v326_v48, %v326_v48  ;;  %v385_v61 = vadd.f32 %v384_v56, %v326_v48  ;;  %v414_v14 = vmul.f32 %v338_v49, %v338_v49 }
  0xe9   : > { %373 = vst [vmem:[%s1084_s29 + $0x30] sm:$0xff] %v338_v49 }
  0xea   : > { %376 = vst [vmem:[%s1084_s29 + $0x48] sm:$0xff] %v1130_v52  ;;  %v425_v4 = vadd.f32 %v424_v60, %v410_v57 }
  0xeb   : > { %380 = vst [vmem:[%s1084_s29 + $0x68] sm:$0xff] %v1133_v53 }
  0xed   : > { %v328_v58 = vpop.f32.mrf.mxu0  ;;  %v340_v59 = vpop.f32.mrf.mxu1 }
  0xee   : > { %v329_v62 = vadd.f32 %v1107_v33, %v328_v58  ;;  %v341_v63 = vadd.f32 %v1107_v33, %v340_v59  ;;  %v349_v0 = vpop.f32.mrf.mxu2  ;;  %v361_v1 = vpop.f32.mrf.mxu3 }
  0xef   : > { %v350_v2 = vadd.f32 %v1107_v33, %v349_v0  ;;  %v1146_v3 = vadd.f32 %v1107_v33, %v361_v1 }
  0xf0   : > { %370 = vst [vmem:[%s1084_s29 + $0x18] sm:$0xff] %v329_v62  ;;  %v386_v5 = vadd.f32 %v385_v61, %v329_v62  ;;  %v411_v6 = vmul.f32 %v329_v62, %v329_v62  ;;  %v415_v16 = vmul.f32 %v341_v63, %v341_v63 }
  0xf1   : > { %374 = vst [vmem:[%s1084_s29 + $0x38] sm:$0xff] %v341_v63 }
  0xf2   : > { %v387_v8 = vadd.f32 %v386_v5, %v332_v37  ;;  %v426_v9 = vadd.f32 %v425_v4, %v411_v6  ;;  %377 = vst [vmem:[%s1084_s29 + $0x50] sm:$0xff] %v350_v2 }
  0xf3   : > { %381 = vst [vmem:[%s1084_s29 + $0x70] sm:$0xff] %v1146_v3 }
  0xf4   : > { %v427_v11 = vadd.f32 %v426_v9, %v412_v7  ;;  %v388_v12 = vadd.f32 %v387_v8, %v335_v41 }
  0xf6   : > { %v389_v13 = vadd.f32 %v388_v12, %v338_v49  ;;  %v428_v15 = vadd.f32 %v427_v11, %v413_v10  ;;  %v352_v17 = vpop.f32.mrf.mxu2  ;;  %v364_v18 = vpop.f32.mrf.mxu3 }
  0xf7   : > { %v353_v19 = vadd.f32 %v1107_v33, %v352_v17  ;;  %v365_v20 = vadd.f32 %v1107_v33, %v364_v18 }
  0xf8   : > { %v429_v21 = vadd.f32 %v428_v15, %v414_v14  ;;  %v390_v22 = vadd.f32 %v389_v13, %v341_v63 }
  0xf9   : > { %378 = vst [vmem:[%s1084_s29 + $0x58] sm:$0xff] %v353_v19 }
  0xfa   : > { %v391_v24 = vadd.f32 %v390_v22, %v1116_v44  ;;  %v430_v25 = vadd.f32 %v429_v21, %v415_v16  ;;  %382 = vst [vmem:[%s1084_s29 + $0x78] sm:$0xff] %v365_v20 }
  0xfb   : > { %828 = shalt.err (!%p825_p12)
}
  0xfc   : > { %s937_s28 = smov 128   ;;  %s938_s29 = smov 8   ;;  %v417_v26 = vmul.f32 %v1130_v52, %v1130_v52  ;;  %v431_v27 = vadd.f32 %v430_v25, %v416_v23  ;;  %v392_v28 = vadd.f32 %v391_v24, %v1130_v52  ;;  %v418_v30 = vmul.f32 %v350_v2, %v350_v2  ;;  %v407_v60 = vld [vmem:[#allocation10] sm:$0x1] }
  0xfd   : > { %670 = dma.vmem_to_hbm [thread:$0]  (%p1040_p3), %s461_s17, 2048, %s463_s16, %s448_s23, %s937_s28, %s937_s28, %s938_s29   ;;  %v419_v32 = vmul.f32 %v353_v19, %v353_v19  ;;  %v420_v35 = vmul.f32 %v1119_v45, %v1119_v45  ;;  %v421_v38 = vmul.f32 %v1133_v53, %v1133_v53  ;;  %v422_v42 = vmul.f32 %v1146_v3, %v1146_v3 }
  0xfe   : > { %v393_v29 = vadd.f32 %v392_v28, %v350_v2  ;;  %v432_v31 = vadd.f32 %v431_v27, %v417_v26  ;;  %v423_v44 = vmul.f32 %v365_v20, %v365_v20  ;;  %s939_s13 = smov [#allocation8]   ;;  %s477_s10 = sshll.u32 %s1222_s4, 4  ;;  %s478_s10 = int_to_ptr.hbm [resolvable:$true] %s477_s10 }
  0xff   : > { %s475_s27 = sshll.u32 %s939_s13, 4  ;;  %s940_s17 = smov [#allocation10]   ;;  %s476_s27 = int_to_ptr.vmem [resolvable:$true] %s475_s27 }
 0x100   : > { %v433_v33 = vadd.f32 %v432_v31, %v418_v30  ;;  %v394_v34 = vadd.f32 %v393_v29, %v353_v19  ;;  %s487_s16 = sshll.u32 %s940_s17, 4  ;;  %s489_s14 = sshll.u32 %s1223_s5, 4  ;;  %s488_s16 = int_to_ptr.vmem [resolvable:$true] %s487_s16  ;;  %s490_s14 = int_to_ptr.hbm [resolvable:$true] %s489_s14 }
 0x101   : > { %p1233_p3 = scmp.eq.s32.totalorder %s992_s22, 3 }
 0x102   : > { %v395_v36 = vadd.f32 %v394_v34, %v1119_v45  ;;  %v434_v37 = vadd.f32 %v433_v33, %v419_v32 }
 0x103   : > { %p1234_p13 = pmov %p1233_p3  ;;  %p1235_p0 = pmov %p1233_p3 }
 0x104   : > { %v435_v39 = vadd.f32 %v434_v37, %v420_v35  ;;  %v396_v40 = vadd.f32 %v395_v36, %v1133_v53  ;;  %v383_v53 = vld [vmem:[#allocation8] sm:$0x1] }
 0x106   : > { %v397_v41 = vadd.f32 %v396_v40, %v1146_v3  ;;  %v436_v43 = vadd.f32 %v435_v39, %v421_v38 }
 0x108   : > { %v437_v46 = vadd.f32 %v436_v43, %v422_v42  ;;  %v398_v47 = vadd.f32 %v397_v41, %v365_v20 }
 0x10a   : > { %v399_v48 = vrot.slane %v398_v47, 4  ;;  %v438_v49 = vadd.f32 %v437_v46, %v423_v44 }
 0x10c   : > { %v400_v50 = vadd.f32 %v399_v48, %v398_v47  ;;  %v439_v45 = vrot.slane %v438_v49, 4 }
 0x10e   : > { %v401_v51 = vrot.slane %v400_v50, 2  ;;  %v440_v52 = vadd.f32 %v439_v45, %v438_v49 }
 0x110   : > { %v441_v54 = vrot.slane %v440_v52, 2  ;;  %v402_v55 = vadd.f32 %v401_v51, %v400_v50 }
 0x112   : > { %v403_v56 = vrot.slane %v402_v55, 1  ;;  %v442_v57 = vadd.f32 %v441_v54, %v440_v52 }
 0x114   : > { %v404_v58 = vadd.f32 %v403_v56, %v402_v55  ;;  %v443_v59 = vrot.slane %v442_v57, 1 }
 0x116   : > { %v405_v61 = vadd.f32 %v404_v58, %v383_v53  ;;  %v444_v62 = vadd.f32 %v443_v59, %v442_v57 }
 0x118   : > { %406 = vst [vmem:[#allocation8] sm:$0x1] %v405_v61  ;;  %v445_v63 = vadd.f32 %v444_v62, %v407_v60 }
 0x119   : > { %672 = dma.vmem_to_hbm [thread:$0]  (%p1233_p3), %s476_s27, 16, %s478_s10, [#allocation9]  }
 0x11a   : > { %446 = vst [vmem:[#allocation10] sm:$0x1] %v445_v63 }
 0x11b   : > { %674 = dma.vmem_to_hbm [thread:$0]  (%p1234_p13), %s488_s16, 16, %s490_s14, [#allocation9]  }
 0x11c   : > { %910 = dma.done.wait (%p1235_p0), [#allocation9], 32   ;;  %p1236_p5 = pmov %p1235_p0 }
 0x11e   : > { %912 = vsyncadd (%p1236_p5), [#allocation9], 4294967264 }
 0x11f PF: > { %p699_p7 = scmp.ge.s32.totalorder %s931_s21, 2  ;;  %s511_s11 = sand.u32 1, %s919_s18  }
 0x120   : > { %s512_s8 = scalar_lea.sflag [#allocation4], %s511_s11 }
 0x121   : > { %p689_p2 = pnand %p699_p7, %p1006_p6 }
 0x123   : > { %p690_p1 = pneg %p689_p2 }
 0x125   : > { %914 = dma.done.wait (%p690_p1), %s512_s8, 2048  }
 0x126   : > { %916 = vsyncadd (%p690_p1), %s512_s8, 4294965248  ;;  %p21_p4 = scmp.ge.s32.totalorder %s1024_s7, 6   ;;  %s1237_s18 = smov %s923_s19 }
 0x127   : > { %s1238_s19 = smov %s927_s20  ;;  %s1239_s20 = smov %s1036_s12 }
 0x128   : > { %s1240_s21 = smov %s1024_s7  ;;  %23 = sbr.rel (!%p21_p4) target bundleno = 7 (0x7), region = 101 }
 0x12d   :  { %518 = vsyncpa [#allocation3], 1 }
 0x12e   :  { %520 = vsyncpa [#allocation3 + $0x1], 1 }
 0x12f   :  { %521 = vsyncpa [#allocation6], 1 }
 0x130   :  { %522 = vsyncpa [#allocation4], 1 }
 0x131   :  { %524 = vsyncpa [#allocation4 + $0x1], 1 }
 0x132   :  { %525 = vsyncpa [#allocation9], 1 }

</bundles_post_ra>
